<compile_context>
chip_gen: v5e
topology: v5e:2x2
jax: 0.10.0
libtpu: 0.0.40
codegen_flags: <defaults>
</compile_context>

<pallas_src>
import functools
import math

import jax
import jax.numpy as jnp
from jax.experimental import pallas as pl
from jax.experimental.pallas import tpu as pltpu


def _gelu_tanh(x):
    # tanh-approximate GELU (PyTorch nn.GELU(approximate='tanh')); tanh runs on the EUP.
    c = 0.7978845608028654  # sqrt(2/pi)
    return 0.5 * x * (1.0 + jnp.tanh(c * (x + 0.044715 * x * x * x)))


def _layer_norm(x, gamma, beta, eps):
    mu = jnp.mean(x, axis=-1, keepdims=True)
    d = x - mu
    var = jnp.mean(d * d, axis=-1, keepdims=True)
    return d * jax.lax.rsqrt(var + eps) * gamma + beta


def bert_encoder_kernel(x_ref, mask_ref,
                        wqkv_ref, bqkv_ref, wo_ref, bo_ref,
                        g1_ref, be1_ref,
                        w1_ref, b1_ref, w2_ref, b2_ref,
                        g2_ref, be2_ref,
                        o_ref,
                        h_ref, ctx_ref,
                        *, eps, num_heads):
    l = pl.program_id(1)
    n_layers = pl.num_programs(1)

    # Layer 0 of each batch element: load the input activation into the persistent
    # VMEM carry.  For l > 0, h_ref holds the previous layer's output (same b).
    @pl.when(l == 0)
    def _():
        h_ref[...] = x_ref[0].astype(jnp.float32)

    x = h_ref[...]                                    # (S, H) f32
    S, H = x.shape
    nh = num_heads
    hd = H // nh
    scale = 1.0 / math.sqrt(hd)

    # ---- fused QKV projection: one lane-dense (S,H)@(H,3H) MXU matmul ----------
    qkv = jnp.dot(x, wqkv_ref[0], preferred_element_type=jnp.float32) + bqkv_ref[0]

    # split into head-batched (nh, S, hd) tensors: static lane slices + a stack
    # along a new leading (untiled) dim — no lane-crossing reshapes.
    q3 = jnp.stack([qkv[:, h * hd:(h + 1) * hd] for h in range(nh)], axis=0)
    k3 = jnp.stack([qkv[:, H + h * hd:H + (h + 1) * hd] for h in range(nh)], axis=0)
    v3 = jnp.stack([qkv[:, 2 * H + h * hd:2 * H + (h + 1) * hd] for h in range(nh)], axis=0)

    # ---- head-batched scaled-dot-product attention ------------------------------
    s = jnp.einsum('hqd,hkd->hqk', q3, k3,
                   preferred_element_type=jnp.float32) * scale        # (nh, S, S)
    s = s + mask_ref[...]                       # additive key mask (1,1,S) broadcast
    s = s - jnp.max(s, axis=-1, keepdims=True)  # stable softmax (un-normalized)
    p = jnp.exp(s)
    denom = jnp.sum(p, axis=-1, keepdims=True)  # (nh, S, 1)
    ctx = jnp.einsum('hqk,hkd->hqd', p, v3,
                     preferred_element_type=jnp.float32)              # (nh, S, hd)
    # deferred normalization on the small (S,hd) context; reciprocal goes to the EUP
    ctx = ctx * pl.reciprocal(denom, approx=True)

    # re-pack heads lane-wise (nh,S,hd) -> (S,H) via static slice stores to VMEM
    for h in range(nh):
        ctx_ref[:, h * hd:(h + 1) * hd] = ctx[h]

    # ---- output projection: single (S,H)@(H,H) matmul ---------------------------
    attn = jnp.dot(ctx_ref[...], wo_ref[0],
                   preferred_element_type=jnp.float32) + bo_ref[0]

    # residual + LayerNorm 1
    x = _layer_norm(x + attn, g1_ref[0], be1_ref[0], eps)

    # ---- FFN: Linear -> GELU(tanh) -> Linear ------------------------------------
    h1 = jnp.dot(x, w1_ref[0], preferred_element_type=jnp.float32) + b1_ref[0]
    h1 = _gelu_tanh(h1)
    ffn = jnp.dot(h1, w2_ref[0], preferred_element_type=jnp.float32) + b2_ref[0]

    # residual + LayerNorm 2
    x = _layer_norm(x + ffn, g2_ref[0], be2_ref[0], eps)

    # carry the activation to the next layer in VMEM (no HBM round trip)
    h_ref[...] = x

    # write the HBM output only once per batch element, after the last layer
    @pl.when(l == n_layers - 1)
    def _():
        o_ref[0] = x.astype(o_ref.dtype)


def bert_encoder(x, mask, params, *, eps, num_heads):
    B, S, H = x.shape
    L = params['wqkv'].shape[0]
    F = params['w1'].shape[-1]
    nh = num_heads

    def wspec(*dims):
        n = len(dims)
        return pl.BlockSpec((1,) + dims, lambda b, l, _n=n: (l,) + (0,) * _n)

    # rough per-step VMEM working set (double-buffered weights + activations),
    # clamped so it is safe on v5e (16 MiB default) and v7x (64 MiB physical).
    per_layer_w_bytes = 4 * (H * 3 * H + 3 * H + H * H + H + H * F + F + F * H + H + 6 * H)
    act_bytes = 4 * (4 * S * H + S * 3 * H + 2 * nh * S * S + S * F)
    vmem_limit = int(max(16 * 2**20, min(48 * 2**20,
                                         4 * per_layer_w_bytes + 4 * act_bytes + (2 << 20))))

    kern = functools.partial(bert_encoder_kernel, eps=eps, num_heads=nh)
    return pl.pallas_call(
        kern,
        out_shape=jax.ShapeDtypeStruct((B, S, H), x.dtype),
        grid=(B, L),
        in_specs=[
            pl.BlockSpec((1, S, H), lambda b, l: (b, 0, 0)),   # x (read at l==0)
            pl.BlockSpec((1, 1, S), lambda b, l: (b, 0, 0)),   # additive key mask
            wspec(H, 3 * H), wspec(1, 3 * H),                  # fused Wqkv^T, bqkv
            wspec(H, H), wspec(1, H),                          # Wo^T, bo
            wspec(1, H), wspec(1, H),                          # ln1 gamma, beta
            wspec(H, F), wspec(1, F),                          # W1^T, b1
            wspec(F, H), wspec(1, H),                          # W2^T, b2
            wspec(1, H), wspec(1, H),                          # ln2 gamma, beta
        ],
        out_specs=pl.BlockSpec((1, S, H), lambda b, l: (b, 0, 0)),
        scratch_shapes=[
            pltpu.VMEM((S, H), jnp.float32),    # activation carry across layers
            pltpu.VMEM((S, H), jnp.float32),    # head re-pack buffer for out-proj
        ],
        compiler_params=pltpu.CompilerParams(
            dimension_semantics=("parallel", "arbitrary"),
            vmem_limit_bytes=vmem_limit),
    )(x, mask,
      params['wqkv'], params['bqkv'], params['wo'], params['bo'],
      params['g1'], params['be1'], params['w1'], params['b1'],
      params['w2'], params['b2'], params['g2'], params['be2'])


def init_params(key, num_layers, H, F, nh):
    """Deterministic synthetic parameters in PyTorch convention, converted to the
    layouts the kernel consumes (pre-transposed, QKV fused, stacked over layers)."""
    def one_layer(k):
        ks = jax.random.split(k, 8)
        in_w = jax.random.normal(ks[0], (3 * H, H), jnp.float32) * 0.02   # in_proj_weight
        in_b = jax.random.normal(ks[1], (3 * H,), jnp.float32) * 0.02     # in_proj_bias
        wo = jax.random.normal(ks[2], (H, H), jnp.float32) * 0.02         # out_proj.weight
        bo = jax.random.normal(ks[3], (H,), jnp.float32) * 0.02
        w1 = jax.random.normal(ks[4], (F, H), jnp.float32) * 0.02         # intermediate_dense
        b1 = jax.random.normal(ks[5], (F,), jnp.float32) * 0.02
        w2 = jax.random.normal(ks[6], (H, F), jnp.float32) * 0.02         # output_dense
        b2 = jax.random.normal(ks[7], (H,), jnp.float32) * 0.02
        return dict(
            wqkv=in_w.T,                       # (H, 3H): x @ Wqkv, cols = [q | k | v]
            bqkv=in_b.reshape(1, 3 * H),
            wo=wo.T,                           # (H, H)
            bo=bo.reshape(1, H),
            g1=jnp.ones((1, H), jnp.float32),
            be1=jnp.zeros((1, H), jnp.float32),
            w1=w1.T,                           # (H, F)
            b1=b1.reshape(1, F),
            w2=w2.T,                           # (F, H)
            b2=b2.reshape(1, H),
            g2=jnp.ones((1, H), jnp.float32),
            be2=jnp.zeros((1, H), jnp.float32),
        )

    keys = jax.random.split(key, num_layers)
    layers = [one_layer(k) for k in keys]
    return {name: jnp.stack([lp[name] for lp in layers], axis=0) for name in layers[0]}


if __name__ == "__main__":
    # config: hidden_dim=32, num_heads=4, feedforward_dim=64, num_layers=2, eps=1e-5
    B, S, H, FF, NH, L = 2, 8, 32, 64, 4, 2
    EPS = 1e-5

    key = jax.random.PRNGKey(0)
    kx, kp = jax.random.split(key)
    x = jax.random.normal(kx, (B, S, H), jnp.float32)
    # src_key_padding_mask=None in the reference -> additive mask of zeros
    # (a real padding mask would put -inf at padded key positions).
    mask = jnp.zeros((B, 1, S), jnp.float32)

    params = init_params(kp, L, H, FF, NH)
    y = bert_encoder(x, mask, params, eps=EPS, num_heads=NH)
    jax.block_until_ready(y)
    assert y.shape == (B, S, H) and y.dtype == jnp.float32
    print("KERNEL_OK")
</pallas_src>

<mosaic_0001>
module attributes {stable_mosaic.version = 11 : i64} {
  func.func @bert_encoder_kernel(%arg0: i32, %arg1: i32, %arg2: memref<1x8x32xf32, #tpu.memory_space<vmem>>, %arg3: memref<1x1x8xf32, #tpu.memory_space<vmem>>, %arg4: memref<1x32x96xf32, #tpu.memory_space<vmem>>, %arg5: memref<1x1x96xf32, #tpu.memory_space<vmem>>, %arg6: memref<1x32x32xf32, #tpu.memory_space<vmem>>, %arg7: memref<1x1x32xf32, #tpu.memory_space<vmem>>, %arg8: memref<1x1x32xf32, #tpu.memory_space<vmem>>, %arg9: memref<1x1x32xf32, #tpu.memory_space<vmem>>, %arg10: memref<1x32x64xf32, #tpu.memory_space<vmem>>, %arg11: memref<1x1x64xf32, #tpu.memory_space<vmem>>, %arg12: memref<1x64x32xf32, #tpu.memory_space<vmem>>, %arg13: memref<1x1x32xf32, #tpu.memory_space<vmem>>, %arg14: memref<1x1x32xf32, #tpu.memory_space<vmem>>, %arg15: memref<1x1x32xf32, #tpu.memory_space<vmem>>, %arg16: memref<1x8x32xf32, #tpu.memory_space<vmem>>, %arg17: memref<8x32xf32, #tpu.memory_space<vmem>>, %arg18: memref<8x32xf32, #tpu.memory_space<vmem>>) attributes {dimension_semantics = [#tpu.dimension_semantics<parallel>, #tpu.dimension_semantics<arbitrary>], iteration_bounds = array<i64: 2, 2>, scalar_prefetch = 0 : i64, scratch_operands = 2 : i64, tpu.core_type = #tpu.core_type<tc>, window_params = [{transform_indices = @transform_0, window_bounds = array<i64: 1, 8, 32>}, {transform_indices = @transform_1, window_bounds = array<i64: 1, 1, 8>}, {transform_indices = @transform_2, window_bounds = array<i64: 1, 32, 96>}, {transform_indices = @transform_3, window_bounds = array<i64: 1, 1, 96>}, {transform_indices = @transform_4, window_bounds = array<i64: 1, 32, 32>}, {transform_indices = @transform_5, window_bounds = array<i64: 1, 1, 32>}, {transform_indices = @transform_6, window_bounds = array<i64: 1, 1, 32>}, {transform_indices = @transform_7, window_bounds = array<i64: 1, 1, 32>}, {transform_indices = @transform_8, window_bounds = array<i64: 1, 32, 64>}, {transform_indices = @transform_9, window_bounds = array<i64: 1, 1, 64>}, {transform_indices = @transform_10, window_bounds = array<i64: 1, 64, 32>}, {transform_indices = @transform_11, window_bounds = array<i64: 1, 1, 32>}, {transform_indices = @transform_12, window_bounds = array<i64: 1, 1, 32>}, {transform_indices = @transform_13, window_bounds = array<i64: 1, 1, 32>}, {transform_indices = @transform_14, window_bounds = array<i64: 1, 8, 32>}]} {
    %c0_i32 = arith.constant 0 : i32
    %0 = arith.cmpi eq, %arg1, %c0_i32 : i32
    %1 = arith.extui %0 : i1 to i32
    %c0_i32_0 = arith.constant 0 : i32
    %2 = arith.cmpi ne, %1, %c0_i32_0 : i32
    scf.if %2 {
      %c0_73 = arith.constant 0 : index
      %c0_74 = arith.constant 0 : index
      %c0_75 = arith.constant 0 : index
      %156 = vector.load %arg2[%c0_73, %c0_74, %c0_75] : memref<1x8x32xf32, #tpu.memory_space<vmem>>, vector<1x8x32xf32>
      %157 = vector.shape_cast %156 : vector<1x8x32xf32> to vector<8x32xf32>
      %c0_76 = arith.constant 0 : index
      %c0_77 = arith.constant 0 : index
      %158 = vector.load %arg17[%c0_76, %c0_77] : memref<8x32xf32, #tpu.memory_space<vmem>>, vector<8x32xf32>
      tpu.vector_store %arg17[%c0_76, %c0_77], %157 {strides = array<i32>} : memref<8x32xf32, #tpu.memory_space<vmem>>, vector<8x32xf32>,
    } else {
    }
    %c0 = arith.constant 0 : index
    %c0_1 = arith.constant 0 : index
    %3 = vector.load %arg17[%c0, %c0_1] : memref<8x32xf32, #tpu.memory_space<vmem>>, vector<8x32xf32>
    %c0_2 = arith.constant 0 : index
    %c0_3 = arith.constant 0 : index
    %c0_4 = arith.constant 0 : index
    %4 = vector.load %arg4[%c0_2, %c0_3, %c0_4] : memref<1x32x96xf32, #tpu.memory_space<vmem>>, vector<1x32x96xf32>
    %5 = vector.shape_cast %4 : vector<1x32x96xf32> to vector<32x96xf32>
    %cst = arith.constant dense<0.000000e+00> : vector<8x96xf32>
    %6 = tpu.matmul %3, %5, %cst {dimension_numbers = #tpu.dot_dimension_numbers<[1], [0], [0], [1], [0, 0, 1, 1], [], []>} : vector<8x32xf32>, vector<32x96xf32>, vector<8x96xf32> -> vector<8x96xf32>
    %c0_5 = arith.constant 0 : index
    %c0_6 = arith.constant 0 : index
    %c0_7 = arith.constant 0 : index
    %7 = vector.load %arg5[%c0_5, %c0_6, %c0_7] : memref<1x1x96xf32, #tpu.memory_space<vmem>>, vector<1x1x96xf32>
    %8 = vector.shape_cast %7 : vector<1x1x96xf32> to vector<1x96xf32>
    %9 = vector.broadcast %8 : vector<1x96xf32> to vector<8x96xf32>
    %10 = arith.addf %6, %9 : vector<8x96xf32>
    %11 = vector.extract_strided_slice %10 {offsets = [0, 0], sizes = [8, 8], strides = [1, 1]} : vector<8x96xf32> to vector<8x8xf32>
    %12 = vector.extract_strided_slice %10 {offsets = [0, 8], sizes = [8, 8], strides = [1, 1]} : vector<8x96xf32> to vector<8x8xf32>
    %13 = vector.extract_strided_slice %10 {offsets = [0, 16], sizes = [8, 8], strides = [1, 1]} : vector<8x96xf32> to vector<8x8xf32>
    %14 = vector.extract_strided_slice %10 {offsets = [0, 24], sizes = [8, 8], strides = [1, 1]} : vector<8x96xf32> to vector<8x8xf32>
    %15 = vector.shape_cast %11 : vector<8x8xf32> to vector<1x8x8xf32>
    %16 = vector.shape_cast %12 : vector<8x8xf32> to vector<1x8x8xf32>
    %17 = vector.shape_cast %13 : vector<8x8xf32> to vector<1x8x8xf32>
    %18 = vector.shape_cast %14 : vector<8x8xf32> to vector<1x8x8xf32>
    %19 = tpu.concatenate %15, %16, %17, %18 in 0 : vector<1x8x8xf32>, vector<1x8x8xf32>, vector<1x8x8xf32>, vector<1x8x8xf32> -> vector<4x8x8xf32>
    %20 = vector.extract_strided_slice %10 {offsets = [0, 32], sizes = [8, 8], strides = [1, 1]} : vector<8x96xf32> to vector<8x8xf32>
    %21 = vector.extract_strided_slice %10 {offsets = [0, 40], sizes = [8, 8], strides = [1, 1]} : vector<8x96xf32> to vector<8x8xf32>
    %22 = vector.extract_strided_slice %10 {offsets = [0, 48], sizes = [8, 8], strides = [1, 1]} : vector<8x96xf32> to vector<8x8xf32>
    %23 = vector.extract_strided_slice %10 {offsets = [0, 56], sizes = [8, 8], strides = [1, 1]} : vector<8x96xf32> to vector<8x8xf32>
    %24 = vector.shape_cast %20 : vector<8x8xf32> to vector<1x8x8xf32>
    %25 = vector.shape_cast %21 : vector<8x8xf32> to vector<1x8x8xf32>
    %26 = vector.shape_cast %22 : vector<8x8xf32> to vector<1x8x8xf32>
    %27 = vector.shape_cast %23 : vector<8x8xf32> to vector<1x8x8xf32>
    %28 = tpu.concatenate %24, %25, %26, %27 in 0 : vector<1x8x8xf32>, vector<1x8x8xf32>, vector<1x8x8xf32>, vector<1x8x8xf32> -> vector<4x8x8xf32>
    %29 = vector.extract_strided_slice %10 {offsets = [0, 64], sizes = [8, 8], strides = [1, 1]} : vector<8x96xf32> to vector<8x8xf32>
    %30 = vector.extract_strided_slice %10 {offsets = [0, 72], sizes = [8, 8], strides = [1, 1]} : vector<8x96xf32> to vector<8x8xf32>
    %31 = vector.extract_strided_slice %10 {offsets = [0, 80], sizes = [8, 8], strides = [1, 1]} : vector<8x96xf32> to vector<8x8xf32>
    %32 = vector.extract_strided_slice %10 {offsets = [0, 88], sizes = [8, 8], strides = [1, 1]} : vector<8x96xf32> to vector<8x8xf32>
    %33 = vector.shape_cast %29 : vector<8x8xf32> to vector<1x8x8xf32>
    %34 = vector.shape_cast %30 : vector<8x8xf32> to vector<1x8x8xf32>
    %35 = vector.shape_cast %31 : vector<8x8xf32> to vector<1x8x8xf32>
    %36 = vector.shape_cast %32 : vector<8x8xf32> to vector<1x8x8xf32>
    %37 = tpu.concatenate %33, %34, %35, %36 in 0 : vector<1x8x8xf32>, vector<1x8x8xf32>, vector<1x8x8xf32>, vector<1x8x8xf32> -> vector<4x8x8xf32>
    "tpu.trace_start"() <{level = 10 : i32, message = "hqd,hkd->hqk"}> : () -> ()
    %cst_8 = arith.constant dense<0.000000e+00> : vector<4x8x8xf32>
    %38 = tpu.matmul %19, %28, %cst_8 {dimension_numbers = #tpu.dot_dimension_numbers<[2], [2], [1], [1], [0, 0, 0, 1, 1, 1], [0], [0]>} : vector<4x8x8xf32>, vector<4x8x8xf32>, vector<4x8x8xf32> -> vector<4x8x8xf32>
    "tpu.trace_stop"() : () -> ()
    %cst_9 = arith.constant 0.353553385 : f32
    %39 = vector.broadcast %cst_9 : f32 to vector<4x8x8xf32>
    %40 = arith.mulf %38, %39 : vector<4x8x8xf32>
    %c0_10 = arith.constant 0 : index
    %c0_11 = arith.constant 0 : index
    %c0_12 = arith.constant 0 : index
    %41 = vector.load %arg3[%c0_10, %c0_11, %c0_12] : memref<1x1x8xf32, #tpu.memory_space<vmem>>, vector<1x1x8xf32>
    %42 = vector.broadcast %41 : vector<1x1x8xf32> to vector<4x8x8xf32>
    %43 = arith.addf %40, %42 : vector<4x8x8xf32>
    %cst_13 = arith.constant dense<0xFF800000> : vector<4x8xf32>
    %44 = vector.multi_reduction <maximumf>, %43, %cst_13 [2] : vector<4x8x8xf32> to vector<4x8xf32>
    %45 = vector.shape_cast %44 : vector<4x8xf32> to vector<4x8x1xf32>
    %46 = vector.broadcast %45 : vector<4x8x1xf32> to vector<4x8x8xf32>
    %47 = arith.subf %43, %46 : vector<4x8x8xf32>
    %48 = math.exp %47 : vector<4x8x8xf32>
    %cst_14 = arith.constant dense<0.000000e+00> : vector<4x8xf32>
    %49 = vector.multi_reduction <add>, %48, %cst_14 [2] : vector<4x8x8xf32> to vector<4x8xf32>
    %50 = vector.shape_cast %49 : vector<4x8xf32> to vector<4x8x1xf32>
    "tpu.trace_start"() <{level = 10 : i32, message = "hqk,hkd->hqd"}> : () -> ()
    %cst_15 = arith.constant dense<0.000000e+00> : vector<4x8x8xf32>
    %51 = tpu.matmul %48, %37, %cst_15 {dimension_numbers = #tpu.dot_dimension_numbers<[2], [1], [1], [2], [0, 0, 0, 1, 1, 2], [0], [0]>} : vector<4x8x8xf32>, vector<4x8x8xf32>, vector<4x8x8xf32> -> vector<4x8x8xf32>
    "tpu.trace_stop"() : () -> ()
    %52 = tpu.reciprocal %50 {approx = true} : vector<4x8x1xf32> -> vector<4x8x1xf32>
    %53 = vector.broadcast %52 : vector<4x8x1xf32> to vector<4x8x8xf32>
    %54 = arith.mulf %51, %53 : vector<4x8x8xf32>
    %55 = vector.extract_strided_slice %54 {offsets = [0, 0, 0], sizes = [1, 8, 8], strides = [1, 1, 1]} : vector<4x8x8xf32> to vector<1x8x8xf32>
    %56 = vector.shape_cast %55 : vector<1x8x8xf32> to vector<8x8xf32>
    %c0_16 = arith.constant 0 : index
    %c0_17 = arith.constant 0 : index
    %57 = vector.load %arg18[%c0_16, %c0_17] : memref<8x32xf32, #tpu.memory_space<vmem>>, vector<8x8xf32>
    tpu.vector_store %arg18[%c0_16, %c0_17], %56 {strides = array<i32>} : memref<8x32xf32, #tpu.memory_space<vmem>>, vector<8x8xf32>,
    %58 = vector.extract_strided_slice %54 {offsets = [1, 0, 0], sizes = [1, 8, 8], strides = [1, 1, 1]} : vector<4x8x8xf32> to vector<1x8x8xf32>
    %59 = vector.shape_cast %58 : vector<1x8x8xf32> to vector<8x8xf32>
    %c0_18 = arith.constant 0 : index
    %c8 = arith.constant 8 : index
    %60 = vector.load %arg18[%c0_18, %c8] : memref<8x32xf32, #tpu.memory_space<vmem>>, vector<8x8xf32>
    tpu.vector_store %arg18[%c0_18, %c8], %59 {strides = array<i32>} : memref<8x32xf32, #tpu.memory_space<vmem>>, vector<8x8xf32>,
    %61 = vector.extract_strided_slice %54 {offsets = [2, 0, 0], sizes = [1, 8, 8], strides = [1, 1, 1]} : vector<4x8x8xf32> to vector<1x8x8xf32>
    %62 = vector.shape_cast %61 : vector<1x8x8xf32> to vector<8x8xf32>
    %c0_19 = arith.constant 0 : index
    %c16 = arith.constant 16 : index
    %63 = vector.load %arg18[%c0_19, %c16] : memref<8x32xf32, #tpu.memory_space<vmem>>, vector<8x8xf32>
    tpu.vector_store %arg18[%c0_19, %c16], %62 {strides = array<i32>} : memref<8x32xf32, #tpu.memory_space<vmem>>, vector<8x8xf32>,
    %64 = vector.extract_strided_slice %54 {offsets = [3, 0, 0], sizes = [1, 8, 8], strides = [1, 1, 1]} : vector<4x8x8xf32> to vector<1x8x8xf32>
    %65 = vector.shape_cast %64 : vector<1x8x8xf32> to vector<8x8xf32>
    %c0_20 = arith.constant 0 : index
    %c24 = arith.constant 24 : index
    %66 = vector.load %arg18[%c0_20, %c24] : memref<8x32xf32, #tpu.memory_space<vmem>>, vector<8x8xf32>
    tpu.vector_store %arg18[%c0_20, %c24], %65 {strides = array<i32>} : memref<8x32xf32, #tpu.memory_space<vmem>>, vector<8x8xf32>,
    %c0_21 = arith.constant 0 : index
    %c0_22 = arith.constant 0 : index
    %67 = vector.load %arg18[%c0_21, %c0_22] : memref<8x32xf32, #tpu.memory_space<vmem>>, vector<8x32xf32>
    %c0_23 = arith.constant 0 : index
    %c0_24 = arith.constant 0 : index
    %c0_25 = arith.constant 0 : index
    %68 = vector.load %arg6[%c0_23, %c0_24, %c0_25] : memref<1x32x32xf32, #tpu.memory_space<vmem>>, vector<1x32x32xf32>
    %69 = vector.shape_cast %68 : vector<1x32x32xf32> to vector<32x32xf32>
    %cst_26 = arith.constant dense<0.000000e+00> : vector<8x32xf32>
    %70 = tpu.matmul %67, %69, %cst_26 {dimension_numbers = #tpu.dot_dimension_numbers<[1], [0], [0], [1], [0, 0, 1, 1], [], []>} : vector<8x32xf32>, vector<32x32xf32>, vector<8x32xf32> -> vector<8x32xf32>
    %c0_27 = arith.constant 0 : index
    %c0_28 = arith.constant 0 : index
    %c0_29 = arith.constant 0 : index
    %71 = vector.load %arg7[%c0_27, %c0_28, %c0_29] : memref<1x1x32xf32, #tpu.memory_space<vmem>>, vector<1x1x32xf32>
    %72 = vector.shape_cast %71 : vector<1x1x32xf32> to vector<1x32xf32>
    %73 = vector.broadcast %72 : vector<1x32xf32> to vector<8x32xf32>
    %74 = arith.addf %70, %73 : vector<8x32xf32>
    %75 = arith.addf %3, %74 : vector<8x32xf32>
    %c0_30 = arith.constant 0 : index
    %c0_31 = arith.constant 0 : index
    %c0_32 = arith.constant 0 : index
    %76 = vector.load %arg8[%c0_30, %c0_31, %c0_32] : memref<1x1x32xf32, #tpu.memory_space<vmem>>, vector<1x1x32xf32>
    %77 = vector.shape_cast %76 : vector<1x1x32xf32> to vector<1x32xf32>
    %c0_33 = arith.constant 0 : index
    %c0_34 = arith.constant 0 : index
    %c0_35 = arith.constant 0 : index
    %78 = vector.load %arg9[%c0_33, %c0_34, %c0_35] : memref<1x1x32xf32, #tpu.memory_space<vmem>>, vector<1x1x32xf32>
    %79 = vector.shape_cast %78 : vector<1x1x32xf32> to vector<1x32xf32>
    %cst_36 = arith.constant dense<0.000000e+00> : vector<8xf32>
    %80 = vector.multi_reduction <add>, %75, %cst_36 [1] : vector<8x32xf32> to vector<8xf32>
    %81 = vector.shape_cast %80 : vector<8xf32> to vector<8x1xf32>
    %cst_37 = arith.constant 3.200000e+01 : f32
    %82 = vector.broadcast %cst_37 : f32 to vector<8x1xf32>
    %83 = arith.divf %81, %82 : vector<8x1xf32>
    %84 = vector.broadcast %83 : vector<8x1xf32> to vector<8x32xf32>
    %85 = arith.subf %75, %84 : vector<8x32xf32>
    %86 = arith.mulf %85, %85 : vector<8x32xf32>
    %cst_38 = arith.constant dense<0.000000e+00> : vector<8xf32>
    %87 = vector.multi_reduction <add>, %86, %cst_38 [1] : vector<8x32xf32> to vector<8xf32>
    %88 = vector.shape_cast %87 : vector<8xf32> to vector<8x1xf32>
    %cst_39 = arith.constant 3.200000e+01 : f32
    %89 = vector.broadcast %cst_39 : f32 to vector<8x1xf32>
    %90 = arith.divf %88, %89 : vector<8x1xf32>
    %cst_40 = arith.constant 9.99999974E-6 : f32
    %91 = vector.broadcast %cst_40 : f32 to vector<8x1xf32>
    %92 = arith.addf %90, %91 : vector<8x1xf32>
    %93 = math.rsqrt %92 : vector<8x1xf32>
    %94 = vector.broadcast %93 : vector<8x1xf32> to vector<8x32xf32>
    %95 = arith.mulf %85, %94 : vector<8x32xf32>
    %96 = vector.broadcast %77 : vector<1x32xf32> to vector<8x32xf32>
    %97 = arith.mulf %95, %96 : vector<8x32xf32>
    %98 = vector.broadcast %79 : vector<1x32xf32> to vector<8x32xf32>
    %99 = arith.addf %97, %98 : vector<8x32xf32>
    %c0_41 = arith.constant 0 : index
    %c0_42 = arith.constant 0 : index
    %c0_43 = arith.constant 0 : index
    %100 = vector.load %arg10[%c0_41, %c0_42, %c0_43] : memref<1x32x64xf32, #tpu.memory_space<vmem>>, vector<1x32x64xf32>
    %101 = vector.shape_cast %100 : vector<1x32x64xf32> to vector<32x64xf32>
    %cst_44 = arith.constant dense<0.000000e+00> : vector<8x64xf32>
    %102 = tpu.matmul %99, %101, %cst_44 {dimension_numbers = #tpu.dot_dimension_numbers<[1], [0], [0], [1], [0, 0, 1, 1], [], []>} : vector<8x32xf32>, vector<32x64xf32>, vector<8x64xf32> -> vector<8x64xf32>
    %c0_45 = arith.constant 0 : index
    %c0_46 = arith.constant 0 : index
    %c0_47 = arith.constant 0 : index
    %103 = vector.load %arg11[%c0_45, %c0_46, %c0_47] : memref<1x1x64xf32, #tpu.memory_space<vmem>>, vector<1x1x64xf32>
    %104 = vector.shape_cast %103 : vector<1x1x64xf32> to vector<1x64xf32>
    %105 = vector.broadcast %104 : vector<1x64xf32> to vector<8x64xf32>
    %106 = arith.addf %102, %105 : vector<8x64xf32>
    %cst_48 = arith.constant 5.000000e-01 : f32
    %107 = vector.broadcast %cst_48 : f32 to vector<8x64xf32>
    %108 = arith.mulf %107, %106 : vector<8x64xf32>
    %cst_49 = arith.constant 4.471500e-02 : f32
    %109 = vector.broadcast %cst_49 : f32 to vector<8x64xf32>
    %110 = arith.mulf %109, %106 : vector<8x64xf32>
    %111 = arith.mulf %110, %106 : vector<8x64xf32>
    %112 = arith.mulf %111, %106 : vector<8x64xf32>
    %113 = arith.addf %106, %112 : vector<8x64xf32>
    %cst_50 = arith.constant 0.797884583 : f32
    %114 = vector.broadcast %cst_50 : f32 to vector<8x64xf32>
    %115 = arith.mulf %114, %113 : vector<8x64xf32>
    %116 = math.tanh %115 : vector<8x64xf32>
    %cst_51 = arith.constant 1.000000e+00 : f32
    %117 = vector.broadcast %cst_51 : f32 to vector<8x64xf32>
    %118 = arith.addf %117, %116 : vector<8x64xf32>
    %119 = arith.mulf %108, %118 : vector<8x64xf32>
    %c0_52 = arith.constant 0 : index
    %c0_53 = arith.constant 0 : index
    %c0_54 = arith.constant 0 : index
    %120 = vector.load %arg12[%c0_52, %c0_53, %c0_54] : memref<1x64x32xf32, #tpu.memory_space<vmem>>, vector<1x64x32xf32>
    %121 = vector.shape_cast %120 : vector<1x64x32xf32> to vector<64x32xf32>
    %cst_55 = arith.constant dense<0.000000e+00> : vector<8x32xf32>
    %122 = tpu.matmul %119, %121, %cst_55 {dimension_numbers = #tpu.dot_dimension_numbers<[1], [0], [0], [1], [0, 0, 1, 1], [], []>} : vector<8x64xf32>, vector<64x32xf32>, vector<8x32xf32> -> vector<8x32xf32>
    %c0_56 = arith.constant 0 : index
    %c0_57 = arith.constant 0 : index
    %c0_58 = arith.constant 0 : index
    %123 = vector.load %arg13[%c0_56, %c0_57, %c0_58] : memref<1x1x32xf32, #tpu.memory_space<vmem>>, vector<1x1x32xf32>
    %124 = vector.shape_cast %123 : vector<1x1x32xf32> to vector<1x32xf32>
    %125 = vector.broadcast %124 : vector<1x32xf32> to vector<8x32xf32>
    %126 = arith.addf %122, %125 : vector<8x32xf32>
    %127 = arith.addf %99, %126 : vector<8x32xf32>
    %c0_59 = arith.constant 0 : index
    %c0_60 = arith.constant 0 : index
    %c0_61 = arith.constant 0 : index
    %128 = vector.load %arg14[%c0_59, %c0_60, %c0_61] : memref<1x1x32xf32, #tpu.memory_space<vmem>>, vector<1x1x32xf32>
    %129 = vector.shape_cast %128 : vector<1x1x32xf32> to vector<1x32xf32>
    %c0_62 = arith.constant 0 : index
    %c0_63 = arith.constant 0 : index
    %c0_64 = arith.constant 0 : index
    %130 = vector.load %arg15[%c0_62, %c0_63, %c0_64] : memref<1x1x32xf32, #tpu.memory_space<vmem>>, vector<1x1x32xf32>
    %131 = vector.shape_cast %130 : vector<1x1x32xf32> to vector<1x32xf32>
    %cst_65 = arith.constant dense<0.000000e+00> : vector<8xf32>
    %132 = vector.multi_reduction <add>, %127, %cst_65 [1] : vector<8x32xf32> to vector<8xf32>
    %133 = vector.shape_cast %132 : vector<8xf32> to vector<8x1xf32>
    %cst_66 = arith.constant 3.200000e+01 : f32
    %134 = vector.broadcast %cst_66 : f32 to vector<8x1xf32>
    %135 = arith.divf %133, %134 : vector<8x1xf32>
    %136 = vector.broadcast %135 : vector<8x1xf32> to vector<8x32xf32>
    %137 = arith.subf %127, %136 : vector<8x32xf32>
    %138 = arith.mulf %137, %137 : vector<8x32xf32>
    %cst_67 = arith.constant dense<0.000000e+00> : vector<8xf32>
    %139 = vector.multi_reduction <add>, %138, %cst_67 [1] : vector<8x32xf32> to vector<8xf32>
    %140 = vector.shape_cast %139 : vector<8xf32> to vector<8x1xf32>
    %cst_68 = arith.constant 3.200000e+01 : f32
    %141 = vector.broadcast %cst_68 : f32 to vector<8x1xf32>
    %142 = arith.divf %140, %141 : vector<8x1xf32>
    %cst_69 = arith.constant 9.99999974E-6 : f32
    %143 = vector.broadcast %cst_69 : f32 to vector<8x1xf32>
    %144 = arith.addf %142, %143 : vector<8x1xf32>
    %145 = math.rsqrt %144 : vector<8x1xf32>
    %146 = vector.broadcast %145 : vector<8x1xf32> to vector<8x32xf32>
    %147 = arith.mulf %137, %146 : vector<8x32xf32>
    %148 = vector.broadcast %129 : vector<1x32xf32> to vector<8x32xf32>
    %149 = arith.mulf %147, %148 : vector<8x32xf32>
    %150 = vector.broadcast %131 : vector<1x32xf32> to vector<8x32xf32>
    %151 = arith.addf %149, %150 : vector<8x32xf32>
    %c0_70 = arith.constant 0 : index
    %c0_71 = arith.constant 0 : index
    %152 = vector.load %arg17[%c0_70, %c0_71] : memref<8x32xf32, #tpu.memory_space<vmem>>, vector<8x32xf32>
    tpu.vector_store %arg17[%c0_70, %c0_71], %151 {strides = array<i32>} : memref<8x32xf32, #tpu.memory_space<vmem>>, vector<8x32xf32>,
    %c1_i32 = arith.constant 1 : i32
    %153 = arith.cmpi eq, %arg1, %c1_i32 : i32
    %154 = arith.extui %153 : i1 to i32
    %c0_i32_72 = arith.constant 0 : i32
    %155 = arith.cmpi ne, %154, %c0_i32_72 : i32
    scf.if %155 {
      %c0_73 = arith.constant 0 : index
      %c0_74 = arith.constant 0 : index
      %c0_75 = arith.constant 0 : index
      %156 = vector.load %arg16[%c0_73, %c0_74, %c0_75] : memref<1x8x32xf32, #tpu.memory_space<vmem>>, vector<1x8x32xf32>
      %157 = vector.shape_cast %156 : vector<1x8x32xf32> to vector<8x32xf32>
      %158 = vector.shape_cast %151 : vector<8x32xf32> to vector<1x8x32xf32>
      tpu.vector_store %arg16[%c0_73, %c0_74, %c0_75], %158 {strides = array<i32>} : memref<1x8x32xf32, #tpu.memory_space<vmem>>, vector<1x8x32xf32>,
    } else {
    }
    return
  }
  func.func @transform_0(%arg0: i32, %arg1: i32) -> (i32, i32, i32) {
    %c0_i32 = arith.constant 0 : i32
    %c0_i32_0 = arith.constant 0 : i32
    %c0_i32_1 = arith.constant 0 : i32
    return %arg0, %c0_i32, %c0_i32_0 : i32, i32, i32
  }
  func.func @transform_1(%arg0: i32, %arg1: i32) -> (i32, i32, i32) {
    %c0_i32 = arith.constant 0 : i32
    %c0_i32_0 = arith.constant 0 : i32
    %c0_i32_1 = arith.constant 0 : i32
    return %arg0, %c0_i32, %c0_i32_0 : i32, i32, i32
  }
  func.func @transform_2(%arg0: i32, %arg1: i32) -> (i32, i32, i32) {
    %c0_i32 = arith.constant 0 : i32
    %c0_i32_0 = arith.constant 0 : i32
    %c0_i32_1 = arith.constant 0 : i32
    return %arg1, %c0_i32, %c0_i32_0 : i32, i32, i32
  }
  func.func @transform_3(%arg0: i32, %arg1: i32) -> (i32, i32, i32) {
    %c0_i32 = arith.constant 0 : i32
    %c0_i32_0 = arith.constant 0 : i32
    %c0_i32_1 = arith.constant 0 : i32
    return %arg1, %c0_i32, %c0_i32_0 : i32, i32, i32
  }
  func.func @transform_4(%arg0: i32, %arg1: i32) -> (i32, i32, i32) {
    %c0_i32 = arith.constant 0 : i32
    %c0_i32_0 = arith.constant 0 : i32
    %c0_i32_1 = arith.constant 0 : i32
    return %arg1, %c0_i32, %c0_i32_0 : i32, i32, i32
  }
  func.func @transform_5(%arg0: i32, %arg1: i32) -> (i32, i32, i32) {
    %c0_i32 = arith.constant 0 : i32
    %c0_i32_0 = arith.constant 0 : i32
    %c0_i32_1 = arith.constant 0 : i32
    return %arg1, %c0_i32, %c0_i32_0 : i32, i32, i32
  }
  func.func @transform_6(%arg0: i32, %arg1: i32) -> (i32, i32, i32) {
    %c0_i32 = arith.constant 0 : i32
    %c0_i32_0 = arith.constant 0 : i32
    %c0_i32_1 = arith.constant 0 : i32
    return %arg1, %c0_i32, %c0_i32_0 : i32, i32, i32
  }
  func.func @transform_7(%arg0: i32, %arg1: i32) -> (i32, i32, i32) {
    %c0_i32 = arith.constant 0 : i32
    %c0_i32_0 = arith.constant 0 : i32
    %c0_i32_1 = arith.constant 0 : i32
    return %arg1, %c0_i32, %c0_i32_0 : i32, i32, i32
  }
  func.func @transform_8(%arg0: i32, %arg1: i32) -> (i32, i32, i32) {
    %c0_i32 = arith.constant 0 : i32
    %c0_i32_0 = arith.constant 0 : i32
    %c0_i32_1 = arith.constant 0 : i32
    return %arg1, %c0_i32, %c0_i32_0 : i32, i32, i32
  }
  func.func @transform_9(%arg0: i32, %arg1: i32) -> (i32, i32, i32) {
    %c0_i32 = arith.constant 0 : i32
    %c0_i32_0 = arith.constant 0 : i32
    %c0_i32_1 = arith.constant 0 : i32
    return %arg1, %c0_i32, %c0_i32_0 : i32, i32, i32
  }
  func.func @transform_10(%arg0: i32, %arg1: i32) -> (i32, i32, i32) {
    %c0_i32 = arith.constant 0 : i32
    %c0_i32_0 = arith.constant 0 : i32
    %c0_i32_1 = arith.constant 0 : i32
    return %arg1, %c0_i32, %c0_i32_0 : i32, i32, i32
  }
  func.func @transform_11(%arg0: i32, %arg1: i32) -> (i32, i32, i32) {
    %c0_i32 = arith.constant 0 : i32
    %c0_i32_0 = arith.constant 0 : i32
    %c0_i32_1 = arith.constant 0 : i32
    return %arg1, %c0_i32, %c0_i32_0 : i32, i32, i32
  }
  func.func @transform_12(%arg0: i32, %arg1: i32) -> (i32, i32, i32) {
    %c0_i32 = arith.constant 0 : i32
    %c0_i32_0 = arith.constant 0 : i32
    %c0_i32_1 = arith.constant 0 : i32
    return %arg1, %c0_i32, %c0_i32_0 : i32, i32, i32
  }
  func.func @transform_13(%arg0: i32, %arg1: i32) -> (i32, i32, i32) {
    %c0_i32 = arith.constant 0 : i32
    %c0_i32_0 = arith.constant 0 : i32
    %c0_i32_1 = arith.constant 0 : i32
    return %arg1, %c0_i32, %c0_i32_0 : i32, i32, i32
  }
  func.func @transform_14(%arg0: i32, %arg1: i32) -> (i32, i32, i32) {
    %c0_i32 = arith.constant 0 : i32
    %c0_i32_0 = arith.constant 0 : i32
    %c0_i32_1 = arith.constant 0 : i32
    return %arg0, %c0_i32, %c0_i32_0 : i32, i32, i32
  }
}

</mosaic_0001>

<bundles_post_ra>
// kernel: tpu_custom_call.1
= control target key start
LH: loop header
LB: loop body
LE: loop exit
PB: predicated region body
PF: predicated region fallthrough
CT: control target
= control target key end

     0   :  { %s2552_s0 = inlined_call_operand.hbm [shape: f32[2,8,32], index: 0, kind: input, shape index: {}]   ;;  %s2553_s1 = inlined_call_operand.hbm [shape: f32[2,1,8], index: 1, kind: input, shape index: {}]   ;;  %s2554_s2 = inlined_call_operand.vmem [shape: f32[2,32,96], index: 2, kind: input, shape index: {}]   ;;  %s2555_s3 = inlined_call_operand.vmem [shape: f32[2,1,96], index: 3, kind: input, shape index: {}]   ;;  %s2556_s4 = inlined_call_operand.vmem [shape: f32[2,32,32], index: 4, kind: input, shape index: {}]   ;;  %s2557_s5 = inlined_call_operand.hbm [shape: f32[2,1,32], index: 5, kind: input, shape index: {}]   ;;  %s2558_s6 = inlined_call_operand.vmem [shape: f32[2,1,32], index: 6, kind: input, shape index: {}]   ;;  %s2559_s7 = inlined_call_operand.hbm [shape: f32[2,1,32], index: 7, kind: input, shape index: {}]   ;;  %s2560_s8 = inlined_call_operand.vmem [shape: f32[2,32,64], index: 8, kind: input, shape index: {}]   ;;  %s2561_s9 = inlined_call_operand.vmem [shape: f32[2,1,64], index: 9, kind: input, shape index: {}]   ;;  %s2562_s10 = inlined_call_operand.vmem [shape: f32[2,64,32], index: 10, kind: input, shape index: {}]   ;;  %s2563_s11 = inlined_call_operand.vmem [shape: f32[2,1,32], index: 11, kind: input, shape index: {}]   ;;  %s2564_s12 = inlined_call_operand.vmem [shape: f32[2,1,32], index: 12, kind: input, shape index: {}]   ;;  %s2565_s13 = inlined_call_operand.hbm [shape: f32[2,1,32], index: 13, kind: input, shape index: {}]   ;;  %s2566_s14 = inlined_call_operand.hbm [shape: f32[2,8,32], index: 14, kind: output, shape index: {}]  }
   0x1   :  { %2585 = sst [smem:[#allocation34_spill]] %s2552_s0 }
   0x2   :  { %2586 = sst [smem:[#allocation35_spill]] %s2553_s1 }
   0x3   :  { %2587 = sst [smem:[#allocation36_spill]] %s2554_s2 }
   0x4   :  { %2588 = sst [smem:[#allocation37_spill]] %s2555_s3 }
   0x5   :  { %2589 = sst [smem:[#allocation38_spill]] %s2556_s4 }
   0x6   :  { %2590 = sst [smem:[#allocation39_spill]] %s2557_s5 }
   0x7   :  { %2591 = sst [smem:[#allocation40_spill]] %s2558_s6 }
   0x8   :  { %2592 = sst [smem:[#allocation41_spill]] %s2559_s7 }
   0x9   :  { %2593 = sst [smem:[#allocation42_spill]] %s2560_s8 }
   0xa   :  { %2594 = sst [smem:[#allocation43_spill]] %s2561_s9 }
   0xb   :  { %2595 = sst [smem:[#allocation44_spill]] %s2562_s10 }
   0xc   :  { %2596 = sst [smem:[#allocation45_spill]] %s2563_s11 }
   0xd   :  { %2597 = sst [smem:[#allocation46_spill]] %s2564_s12 }
   0xe   :  { %2598 = sst [smem:[#allocation47_spill]] %s2565_s13 }
   0xf   :  { %2599 = sst [smem:[#allocation48_spill]] %s2566_s14 }
  0x10   :  { %19 = vsyncpa [#allocation5], 0 }
  0x11   :  { %21 = vsyncpa [#allocation5 + $0x1], 0 }
  0x12   :  { %22 = vsyncpa [#allocation8], 0 }
  0x13   :  { %24 = vsyncpa [#allocation8 + $0x1], 0 }
  0x14   :  { %25 = vsyncpa [#allocation11], 0 }
  0x15   :  { %27 = vsyncpa [#allocation11 + $0x1], 0 }
  0x16   :  { %28 = vsyncpa [#allocation6], 0 }
  0x17   :  { %30 = vsyncpa [#allocation6 + $0x1], 0  ;;  %s2141_s29 = smov 0   ;;  %s2143_s30 = smov 0  }
  0x18   :  { %s2145_s15 = smov 0   ;;  %s2147_s16 = smov 0  }
  0x19   :  { %s2149_s17 = smov 0   ;;  %s2151_s18 = smov 0  }
  0x1a   :  { %s2153_s19 = smov 0   ;;  %s2155_s20 = smov 0  }
  0x1b   :  { %s2157_s21 = smov 0   ;;  %s2159_s22 = smov 0  }
  0x1c   :  { %s2161_s23 = smov 0  }
  0x1d LB: > { %2600 = sst [smem:[#allocation19_spill]] %s2023_s15  ;;  %s2197_s24 = sadd.s32 4294967295, %s2055_s23   ;;  %s2055_s23 = sphi %s2161_s23, %s36_s23   ;;  %s2051_s22 = sphi %s2159_s22, %s2668_s22   ;;  %s2047_s21 = sphi %s2157_s21, %s2667_s21   ;;  %s2043_s20 = sphi %s2155_s20, %s2666_s20   ;;  %s2039_s19 = sphi %s2153_s19, %s2665_s19   ;;  %s2035_s18 = sphi %s2151_s18, %s2664_s18   ;;  %s2031_s17 = sphi %s2149_s17, %s2663_s17   ;;  %s2027_s16 = sphi %s2147_s16, %s2671_s16   ;;  %s2023_s15 = sphi %s2145_s15, %s2661_s15   ;;  %s2019_s30 = sphi %s2143_s30, %s2670_s30   ;;  %s2015_s29 = sphi %s2141_s29, %s2669_s29  }
  0x1e   : > { %2601 = sst [smem:[#allocation20_spill]] %s2027_s16  ;;  %s1560_s25 = sadd.s32 4294967294, %s2055_s23  }
  0x1f   : > { %2602 = sst [smem:[#allocation21_spill]] %s2031_s17  ;;  %p62_p0 = scmp.ne.s32.totalorder %s2035_s18, %s2031_s17 }
  0x20   : > { %2603 = sst [smem:[#allocation22_spill]] %s2035_s18  ;;  %p63_p1 = scmp.eq.s32.totalorder %s2055_s23, 0 }
  0x21   : > { %2604 = sst [smem:[#allocation23_spill]] %s2039_s19  ;;  %p68_p2 = scmp.ne.s32.totalorder %s2031_s17, %s2027_s16 }
  0x22   : > { %2605 = sst [smem:[#allocation24_spill]] %s2043_s20  ;;  %p69_p3 = scmp.eq.s32.totalorder %s2197_s24, 0 }
  0x23   : > { %2606 = sst [smem:[#allocation25_spill]] %s2047_s21  ;;  %p64_p4 = por %p63_p1, %p62_p0 }
  0x24   : > { %2607 = sst [smem:[#allocation26_spill]] %s2051_s22  ;;  %p430_p5 = scmp.eq.s32.totalorder %s2197_s24, 3 }
  0x25   : > { %p2213_p6 = por %p69_p3, %p68_p2  ;;  %p436_p7 = scmp.eq.s32.totalorder %s1560_s25, 3 }
  0x26   : > { %p2217_p8 = por %p430_p5, %p62_p0  ;;  %p2572_p10 = scmp.lt.s32.totalorder %s2055_s23, 4 }
  0x27   : > { %p2221_p9 = por %p436_p7, %p68_p2  ;;  %s2227_s16 = sand.u32 1, %s2035_s18  }
  0x28   : > { %s2609_s26 = scalar_select %p2217_p8, 1, 0 }
  0x29   : > { %s2611_s27 = scalar_select %p2221_p9, 1, 0 }
  0x2a   : > { %2610 = sst [smem:[#allocation27_spill]] %s2609_s26  ;;  %p2232_p11 = pnand %p2572_p10, %p64_p4 }
  0x2b   : > { %2612 = sst [smem:[#allocation28_spill]] %s2611_s27  ;;  %s478_s14 = scalar_lea.vmem [#allocation7], %s2227_s16 }
  0x2c   : > { %s2614_s1 = sld [smem:[#allocation35_spill]]  ;;  %s485_s11 = sshll.u32 %s478_s14, 4  ;;  %s486_s11 = int_to_ptr.vmem [resolvable:$true] %s485_s11 }
  0x2d   : > { %p1565_p12 = scmp.ge.s32.totalorder %s2055_s23, 1  ;;  %s2615_s10 = sand.u32 1, %s2055_s23  }
  0x2e   : > { %s2244_s9 = scalar_lea.sflag [#allocation8], %s2615_s10  ;;  %p603_p13 = scmp.lt.s32.totalorder %s2055_s23, 5 }
  0x2f   : > { %s45_s26 = sadd.s32 1, %s2047_s21  ;;  %s185_s14 = sadd.s32 1, %s2023_s15 }
  0x30   : > { %p2250_p0 = pnand %p1565_p12, %p603_p13  ;;  %p46_p2 = scmp.ge.s32.totalorder %s45_s26, 2 }
  0x31   : > { %p192_p4 = scmp.ne.s32.totalorder %s2023_s15, %s2019_s30  ;;  %p198_p5 = scmp.ne.s32.totalorder %s2019_s30, %s2015_s29 }
  0x32   : > { %s481_s27 = scalar_lea.hbm %s2614_s1, %s2051_s22  ;;  %s2261_s10 = sand.u32 1, %s2023_s15  }
  0x33   : > { %s483_s12 = sshll.u32 %s481_s27, 4  ;;  %s2673_s26 = smov (%p46_p2, %s45_s26), 0  ;;  %s484_s12 = int_to_ptr.hbm [resolvable:$true] %s483_s12 }
  0x34   : > { %1620 = dma.hbm_to_vmem [thread:$0]  (!%p2232_p11), %s484_s12, 16, %s486_s11, %s2244_s9  }
  0x35   : > { %2617 = sst [smem:[#allocation29_spill]] %s2673_s26  ;;  %s2618_s11 = sadd.s32 1, %s2051_s22 }
  0x36   : > { %s2675_s11 = smov (!%p46_p2, %s2618_s11), %s2051_s22  ;;  %s182_s12 = ssub.s32 %s2047_s21, %s2673_s26 }
  0x37   : > { %p194_p7 = por %p192_p4, %p63_p1  ;;  %p50_p12 = scmp.ge.s32.totalorder %s2675_s11, 2 }
  0x38   : > { %p183_p13 = scmp.eq.s32.totalorder %s182_s12, 0  ;;  %p2274_p10 = por %p198_p5, %p69_p3 }
  0x39   : > { %p2621_p9 = scmp.lt.s32.totalorder %s2055_s23, 4  ;;  %s2677_s11 = smov (%p50_p12, %s2675_s11), 0 }
  0x3a   : > { %s2619_s27 = scalar_select %p2274_p10, 1, 0 }
  0x3b   : > { %p2280_p8 = pnand %p2621_p9, %p194_p7  ;;  %2623 = sst [smem:[#allocation31_spill]] %s2677_s11 }
  0x3c   : > { %2620 = sst [smem:[#allocation30_spill]] %s2619_s27  ;;  %s52_s26 = ssub.s32 %s2051_s22, %s2677_s11 }
  0x3d   : > { %s2287_s1 = scalar_select %p183_p13, %s2023_s15, %s185_s14  }
  0x3e   : > { %p53_p1 = scmp.eq.s32.totalorder %s52_s26, 0  ;;  %s2625_s7 = sld [smem:[#allocation41_spill]] }
  0x3f   : > { %2624 = sst [smem:[#allocation32_spill]] %s2287_s1  ;;  %s2626_s4 = sadd.s32 1, %s2035_s18 }
  0x40   : > { %s2298_s2 = scalar_select %p53_p1, %s2035_s18, %s2626_s4  }
  0x41   : > { %s540_s19 = scalar_lea.vmem [#allocation10], %s2261_s10  ;;  %s2628_s14 = sand.u32 1, %s2055_s23  }
  0x42   : > { %2627 = sst [smem:[#allocation33_spill]] %s2298_s2  ;;  %s547_s27 = sshll.u32 %s540_s19, 4  ;;  %s548_s27 = int_to_ptr.vmem [resolvable:$true] %s547_s27 }
  0x43   : > { %s538_s1 = scalar_lea.sflag [#allocation11], %s2628_s14  ;;  %s1563_s26 = sshll.u32 %s2227_s16, 3 }
  0x44   : > { %s543_s6 = scalar_lea.hbm %s2625_s7, %s2047_s21  ;;  %s1564_s8 = sshll.u32 %s2051_s22, 3 }
  0x45   : > { %s545_s3 = sshll.u32 %s543_s6, 4  ;;  %s2629_s0 = sld [smem:[#allocation34_spill]]  ;;  %s546_s3 = int_to_ptr.hbm [resolvable:$true] %s545_s3 }
  0x46   : > { %1626 = dma.hbm_to_vmem [thread:$0]  (!%p2280_p8), %s546_s3, 16, %s548_s27, %s538_s1  }
  0x47   : > { %s460_s7 = scalar_lea.vmem [#allocation4], %s1563_s26  ;;  %s457_s2 = scalar_lea.sflag [#allocation5], %s2227_s16 }
  0x48   : > { %s468_s11 = sshll.u32 %s460_s7, 4  ;;  %s2630_s5 = sld [smem:[#allocation39_spill]]  ;;  %s469_s11 = int_to_ptr.vmem [resolvable:$true] %s468_s11 }
  0x49   : > { %s517_s22 = scalar_lea.vmem [#allocation9], %s2261_s10  ;;  %s2631_s13 = sld [smem:[#allocation47_spill]] }
  0x4a   : > { %s524_s18 = sshll.u32 %s517_s22, 4  ;;  %s591_s12 = scalar_lea.vmem [#allocation12], %s2261_s10  ;;  %s525_s18 = int_to_ptr.vmem [resolvable:$true] %s524_s18 }
  0x4b   : > { %s464_s6 = scalar_lea.hbm %s2629_s0, %s1564_s8  ;;  %s598_s4 = sshll.u32 %s591_s12, 4  ;;  %s599_s4 = int_to_ptr.vmem [resolvable:$true] %s598_s4 }
  0x4c   : > { %s466_s19 = sshll.u32 %s464_s6, 4  ;;  %s467_s19 = int_to_ptr.hbm [resolvable:$true] %s466_s19 }
  0x4d   : > { %1617 = dma.hbm_to_vmem [thread:$0]  (!%p2232_p11), %s467_s19, 128, %s469_s11, %s457_s2  }
  0x4e   : > { %s520_s14 = scalar_lea.hbm %s2630_s5, %s2047_s21  ;;  %607 = sbr.rel (%p2250_p0) target bundleno = 1995 (0x7cb), region = 76 }
  0x4f   : > { %s522_s15 = sshll.u32 %s520_s14, 4  ;;  %s594_s8 = scalar_lea.hbm %s2631_s13, %s2047_s21  ;;  %s523_s15 = int_to_ptr.hbm [resolvable:$true] %s522_s15 }
  0x50   : > { %1623 = dma.hbm_to_vmem [thread:$0]  (!%p2280_p8), %s523_s15, 16, %s525_s18, %s2244_s9  }
  0x51   : > { %s596_s16 = sshll.u32 %s594_s8, 4  ;;  %s2331_s2 = sand.u32 (!%p2250_p0), 1, %s2031_s17   ;;  %s597_s16 = int_to_ptr.hbm [resolvable:$true] %s596_s16 }
  0x52   : > { %1629 = dma.hbm_to_vmem [thread:$0]  (!%p2280_p8), %s597_s16, 16, %s599_s4, %s538_s1  }
  0x53   : > { %s2582_s9 = sshll.u32 %s2331_s2, 3  ;;  %s610_s15 = scalar_lea.sflag [#allocation5], %s2331_s2 }
  0x54   : > { %s2337_s18 = scalar_lea.vmem [#allocation4], %s2582_s9 }
  0x55   : > { %1994 = dma.done.wait (%p2213_p6), %s610_s15, 128  }
  0x56   : > { %1996 = vsyncadd (%p2213_p6), %s610_s15, 4294967168  ;;  %s619_s1 = sand.u32 1, %s2197_s24  }
  0x57   : > { %s620_s22 = scalar_lea.sflag [#allocation8], %s619_s1 }
  0x58   : > { %1998 = dma.done.wait (%p2213_p6), %s620_s22, 16  }
  0x59   : > { %2000 = vsyncadd (%p2213_p6), %s620_s22, 4294967280  ;;  %s2350_s10 = sand.u32 1, %s2019_s30  }
  0x5a   : > { %2002 = dma.done.wait (%p2274_p10), %s620_s22, 16  }
  0x5b   : > { %2004 = vsyncadd (%p2274_p10), %s620_s22, 4294967280  ;;  %s638_s24 = scalar_lea.sflag [#allocation11], %s619_s1 }
  0x5c   : > { %2006 = dma.done.wait (%p2274_p10), %s638_s24, 32  }
  0x5d   : > { %2008 = vsyncadd (%p2274_p10), %s638_s24, 4294967264  ;;  %s2633_s28 = sld [smem:[#allocation23_spill]]  ;;  %s2643_s25 = sshll.u32 %s2331_s2, 3 }
  0x5e   : > { %s2634_s14 = sld [smem:[#allocation37_spill]] }
  0x5f   : > { %s2635_s12 = sld [smem:[#allocation36_spill]] }
  0x60   : > { %s2636_s1 = sld [smem:[#allocation38_spill]] }
  0x61   : > { %s2638_s0 = sld [smem:[#allocation42_spill]] }
  0x62   : > { %s2640_s21 = sld [smem:[#allocation44_spill]] }
  0x63   : > { %p746_p3 = scmp.lt.s32.totalorder %s2633_s28, 1  ;;  %s2641_s17 = sld [smem:[#allocation45_spill]] }
  0x64   : > { %s2642_s11 = sld [smem:[#allocation46_spill]]  ;;  %p1576_p6 = scmp.ne.s32.totalorder %s2633_s28, 0 }
  0x65   : > { %s2364_s6 = scalar_select %p746_p3, %s2633_s28, 1 }
  0x67   : > { %s1598_s19 = sshll.u32 %s2364_s6, 5  ;;  %s753_s26 = scalar_lea.vmem %s2634_s14, %s2364_s6 }
  0x68   : > { %s750_s4 = scalar_lea.vmem %s2635_s12, %s1598_s19  ;;  %s2377_s22 = scalar_lea.vmem %s2636_s1, %s1598_s19 }
  0x69   : > { %s2386_s5 = scalar_lea.vmem %s2638_s0, %s1598_s19  ;;  %s2639_s14 = sld [smem:[#allocation43_spill]] }
  0x6a   : > { %s1601_s7 = sshll.u32 %s2364_s6, 6  ;;  %s777_s20 = scalar_lea.vmem %s2641_s17, %s2364_s6 }
  0x6b   : > { %s2396_s16 = scalar_lea.vmem %s2640_s21, %s1601_s7  ;;  %s780_s9 = scalar_lea.vmem %s2642_s11, %s2364_s6 }
  0x6c   : > { %s649_s0 = scalar_lea.vmem [#allocation12], %s2350_s10  ;;  %s2409_s19 = scalar_lea.vmem [#allocation13], %s2643_s25 }
  0x6d   : > { %784 = sbr.rel (%p1576_p6) target bundleno = 116 (0x74), region = 100 }
  0x6f   : > { %s769_s13 = scalar_lea.vmem %s2639_s14, %s2364_s6 }
  0x72   : > { %v785_v0 = vld [vmem:[%s2337_s18] sm:$0xff]  ;;  %vm786_vm0 = vcmask 261120  }
  0x73   : > { %787 = vst.msk [vmem:[#allocation2] sm:$0xff] %vm786_vm0, %v785_v0 }
  0x74 PF: > { %v792_v1 = vld [vmem:[%s750_s4 + $0x18] sm:$0xff]  ;;  %v791_v2 = vld [vmem:[%s750_s4 + $0x10] sm:$0xff]  ;;  %v790_v3 = vld [vmem:[%s750_s4 + $0x8] sm:$0xff]  ;;  %vm797_vm1 = vcmask 261120   ;;  %s2057_s17 = smov 104   ;;  %s2058_s21 = smov 120  }
  0x75   : > { %813 = vmatpush.msra.mxu0 %v792_v1  ;;  %v789_v4 = vld [vmem:[%s750_s4] sm:$0xff]  ;;  %s2059_s18 = smov 112   ;;  %s2060_s11 = smov 96   ;;  %vm830_vm2 = vcmask 64512   ;;  %vm1098_vm3 = vcmask 130112   ;;  %vm1104_vm4 = vcmask 195712  }
  0x76   : > { %v1738_v6 = vld [vmem:[%s753_s26] ss:$0 sm:$0xff]  ;;  %s2644_s28 = scalar_lea.vmem [#allocation7], %s2331_s2  ;;  %s2061_s26 = smov 64   ;;  %vm1110_vm5 = vcmask 261312   ;;  %vm1236_vm10 = vcmask 523264  }
  0x77   : > { %814 = vmatpush.msra.mxu0 %v791_v2  ;;  %v1739_v16 = vld [vmem:[%s2644_s28] ss:$0 sm:$0xff]  ;;  %s2062_s4 = smov 16   ;;  %s2063_s3 = smov 8  }
  0x78   : > { %s2064_s27 = smov 24   ;;  %s2645_s14 = scalar_lea.vmem [#allocation9], %s2350_s10 }
  0x79   : > { %815 = vmatpush.msra.mxu0 %v790_v3  ;;  %s2646_s7 = sld [smem:[#allocation40_spill]]  ;;  %s2648_s12 = scalar_lea.vmem [#allocation10], %s2350_s10 }
  0x7a   : > { %v2413_v5 = vld [vmem:[#allocation2] sm:$0xff] }
  0x7b   : > { %816 = vmatpush.msra.mxu0 %v789_v4 }
  0x7c   : > { %1577 = vmatmul.msk.f32.vlgmr.msra.gmra.mxu0 %vm797_vm1, %v2413_v5 }
  0x7f   : > { %s2647_s8 = scalar_lea.vmem %s2646_s7, %s2364_s6 }
  0xf9   : > { %v818_v7 = vpop.f32.mrf.mxu0 }
  0xfa   : > { %v819_v8 = vadd.f32 %v1738_v6, %v818_v7 }
  0xfc   : > { %826 = vrot.lane.b32.xlu1 %v819_v8, %s2057_s17  ;;  %822 = vrot.lane.b32.xlu0 %v819_v8, %s2058_s21  ;;  %s2652_s21 = sld [smem:[#allocation23_spill]] }
 0x102   : > { %p1593_p8 = scmp.ne.s32.totalorder %s2652_s21, 1 }
 0x104   : > { %824 = vrot.lane.b32.xlu0 %v819_v8, %s2059_s18 }
 0x16e   : > { %v827_v9 = vpop.permute.xlu1 %826  ;;  %v823_v10 = vpop.permute.xlu0 %822 }
 0x16f   : > { %907 = vrot.lane.b32.xlu0 %v827_v9, %s2060_s11  ;;  %855 = vrot.lane.b32.xlu1 %v823_v10, %s2060_s11 }
 0x176   : > { %v825_v11 = vpop.permute.xlu0 %824 }
 0x177   : > { %881 = vrot.lane.b32.xlu2 %v825_v11, %s2060_s11  ;;  %v1733_v33 = vpack.i.bf16 %v825_v11, %v823_v10 }
 0x17f   : > { %828 = vrot.lane.b32.xlu2 %v819_v8, %s2060_s11 }
 0x1d1   : > { %v882_v12 = vpop.permute.xlu2 %881 }
 0x1d2   : > { %1582 = vmatpush.xpose.msk.msra.mxu3 %vm830_vm2, %v882_v12  ;;  %v1116_v12 = vld [vmem:[%s2377_s22 + $0x18] sm:$0xff] }
 0x1d5   : > { %1583 = vmatmul.msk.f32.vlgmr.msra.gmra.mxu3 %vm830_vm2, %v825_v11 }
 0x1d9   : > { %v829_v13 = vpop.permute.xlu2 %828 }
 0x1da   : > { %1578 = vmatpush.xpose.msk.msra.mxu1 %vm830_vm2, %v829_v13  ;;  %v1115_v13 = vld [vmem:[%s2377_s22 + $0x10] sm:$0xff] }
 0x1dd   : > { %1579 = vmatmul.msk.f32.vlgmr.msra.gmra.mxu1 %vm830_vm2, %v819_v8 }
 0x1e1   : > { %v856_v14 = vpop.permute.xlu1 %855  ;;  %v908_v15 = vpop.permute.xlu0 %907 }
 0x1e2   : > { %1580 = vmatpush.xpose.msk.msra.mxu2 %vm830_vm2, %v856_v14  ;;  %1584 = vmatpush.xpose.msk.msrb.mxu1 %vm830_vm2, %v908_v15  ;;  %v1114_v14 = vld [vmem:[%s2377_s22 + $0x8] sm:$0xff]  ;;  %v1113_v15 = vld [vmem:[%s2377_s22] sm:$0xff] }
 0x1e5   : > { %1581 = vmatmul.msk.f32.vlgmr.msra.gmra.mxu2 %vm830_vm2, %v823_v10  ;;  %1585 = vmatmul.msk.f32.vlgmr.msrb.gmra.mxu1 %vm830_vm2, %v827_v9 }
 0x258   : > { %v904_v17 = vpop.f32.mrf.mxu3 }
 0x259   : > { %v935_v18 = vmul.f32 0.35355338, %v904_v17 }
 0x25a   : > { %v852_v19 = vpop.f32.mrf.mxu1 }
 0x25b   : > { %v943_v20 = vadd.f32 %v1739_v16, %v935_v18  ;;  %v933_v25 = vmul.f32 0.35355338, %v852_v19 }
 0x25d   : > { %v951_v21 = vsel %vm830_vm2, %v943_v20, -inf  ;;  %v941_v30 = vadd.f32 %v1739_v16, %v933_v25  ;;  %v2065_v25 = vmov 32.0  }
 0x25e   : > { %952 = vmax.xlane.f32.xlu2 %v951_v21 }
 0x25f   : > { %v945_v32 = vsel %vm830_vm2, %v941_v30, -inf }
 0x262   : > { %v930_v22 = vpop.f32.mrf.mxu1 }
 0x263   : > { %v936_v23 = vmul.f32 0.35355338, %v930_v22 }
 0x265   : > { %v944_v24 = vadd.f32 %v1739_v16, %v936_v23 }
 0x267   : > { %v954_v26 = vsel %vm830_vm2, %v944_v24, -inf }
 0x268   : > { %v878_v27 = vpop.f32.mrf.mxu2  ;;  %955 = vmax.xlane.f32.xlu0 %v954_v26 }
 0x269   : > { %v934_v28 = vmul.f32 0.35355338, %v878_v27 }
 0x26b   : > { %v942_v29 = vadd.f32 %v1739_v16, %v934_v28 }
 0x26d   : > { %v948_v31 = vsel %vm830_vm2, %v942_v29, -inf }
 0x26e   : > { %949 = vmax.xlane.f32.xlu1 %v948_v31 }
 0x270   : > { %946 = vmax.xlane.f32.xlu0 %v945_v32 }
 0x276   : > { %1734 = vrot.lane.b32.xlu2 %v1733_v33, %s2061_s26 }
 0x284   : > { %981 = vrot.lane.b32.xlu0 %v819_v8, %s2061_s26 }
 0x287   : > { %1059 = vrot.lane.b32.xlu1 %v827_v9, %s2061_s26 }
 0x2d1   : > { %v953_v34 = vpop.xlane.xlu2 %952 }
 0x2d2   : > { %v959_v35 = vsub.f32 %v943_v20, %v953_v34  ;;  %v1740_v20 = vld [vmem:[%s2645_s14] ss:$0 sm:$0xff] }
 0x2d4   : > { %v965_v36 = vmul.f32 1.442695, %v959_v35 }
 0x2d6   : > { %1747 = vpow2.f32 %v965_v36  ;;  %v1187_v36 = vld [vmem:[%s2386_s5 + $0x18] sm:$0xff] }
 0x2d9   : > { %v1735_v37 = vpop.permute.xlu2 %1734 }
 0x2da   : > { %v1737_v38 = vunpack.i.h.bf16 %v1735_v37  ;;  %v1736_v39 = vunpack.i.l.bf16 %v1735_v37  ;;  %v1186_v37 = vld [vmem:[%s2386_s5 + $0x10] sm:$0xff] }
 0x2db   : > { %v956_v40 = vpop.xlane.xlu0 %955 }
 0x2dc   : > { %v1748_v41 = vpop.eup %1747  ;;  %v960_v42 = vsub.f32 %v944_v24, %v956_v40  ;;  %1028 = vmatpush.msrb.mxu3 %v1736_v39  ;;  %1054 = vmatpush.msra.mxu1 %v1737_v38  ;;  %v1185_v38 = vld [vmem:[%s2386_s5 + $0x8] sm:$0xff]  ;;  %v1184_v39 = vld [vmem:[%s2386_s5] sm:$0xff] }
 0x2dd   : > { %1588 = vmatmul.msk.f32.vlgmr.msra.gmra.mxu1 %vm830_vm2, %v1748_v41  ;;  %v975_v43 = vsel %vm830_vm2, %v1748_v41, 0.0 }
 0x2de   : > { %v967_v44 = vmul.f32 1.442695, %v960_v42  ;;  %976 = vadd.xlane.f32.xlu1 %v975_v43  ;;  %1207 = vmatpush.msra.mxu3 %v1187_v36 }
 0x2e0   : > { %1749 = vpow2.f32 %v967_v44  ;;  %1208 = vmatpush.msra.mxu3 %v1186_v37 }
 0x2e1   : > { %v950_v45 = vpop.xlane.xlu1 %949 }
 0x2e2   : > { %v958_v46 = vsub.f32 %v942_v29, %v950_v45  ;;  %1209 = vmatpush.msra.mxu3 %v1185_v38 }
 0x2e3   : > { %v947_v47 = vpop.xlane.xlu0 %946 }
 0x2e4   : > { %v963_v48 = vmul.f32 1.442695, %v958_v46  ;;  %v957_v49 = vsub.f32 %v941_v30, %v947_v47  ;;  %1210 = vmatpush.msra.mxu3 %v1184_v39 }
 0x2e6   : > { %v1750_v50 = vpop.eup %1749  ;;  %1751 = vpow2.f32 %v963_v48  ;;  %v961_v52 = vmul.f32 1.442695, %v957_v49  ;;  %v1741_v49 = vld [vmem:[%s2647_s8] ss:$0 sm:$0xff] }
 0x2e7   : > { %v978_v51 = vsel %vm830_vm2, %v1750_v50, 0.0 }
 0x2e8   : > { %979 = vadd.xlane.f32.xlu0 %v978_v51  ;;  %1753 = vpow2.f32 %v961_v52  ;;  %v1742_v52 = vld [vmem:[%s2648_s12] ss:$0 sm:$0xff] }
 0x2ec   : > { %v1752_v53 = vpop.eup %1751 }
 0x2ed   : > { %1587 = vmatmul.msk.f32.vlgmr.msrb.gmra.mxu3 %vm830_vm2, %v1752_v53  ;;  %v972_v54 = vsel %vm830_vm2, %v1752_v53, 0.0 }
 0x2ee   : > { %973 = vadd.xlane.f32.xlu2 %v972_v54  ;;  %v1754_v55 = vpop.eup %1753 }
 0x2ef   : > { %v969_v56 = vsel %vm830_vm2, %v1754_v55, 0.0 }
 0x2f6   : > { %970 = vadd.xlane.f32.xlu2 %v969_v56  ;;  %v982_v57 = vpop.permute.xlu0 %981  ;;  %v1230_v56 = vld [vmem:[%s2396_s16 + $0x30] sm:$0xff] }
 0x2f7   : > { %1002 = vmatpush.msrb.mxu2 %v982_v57  ;;  %v1229_v57 = vld [vmem:[%s2396_s16 + $0x28] sm:$0xff] }
 0x2f8   : > { %1586 = vmatmul.msk.f32.vlgmr.msrb.gmra.mxu2 %vm830_vm2, %v1754_v55  ;;  %v1231_v55 = vld [vmem:[%s2396_s16 + $0x38] sm:$0xff] }
 0x2f9   : > { %v1060_v58 = vpop.permute.xlu1 %1059  ;;  %1136 = vmatpush.msra.mxu2 %v1116_v12  ;;  %1248 = vmatpush.msrb.mxu0 %v1231_v55  ;;  %v1744_v12 = vld [vmem:[%s777_s20] ss:$0 sm:$0xff] }
 0x2fa   : > { %1080 = vmatpush.msrb.mxu1 %v1060_v58  ;;  %v1228_v58 = vld [vmem:[%s2396_s16 + $0x20] sm:$0xff] }
 0x2fb   : > { %1589 = vmatmul.msk.f32.vlgmr.msrb.gmra.mxu1 %vm830_vm2, %v1750_v50  ;;  %1137 = vmatpush.msra.mxu2 %v1115_v13 }
 0x2fc   : > { %1249 = vmatpush.msrb.mxu0 %v1230_v56 }
 0x2fd   : > { %1138 = vmatpush.msra.mxu2 %v1114_v14 }
 0x2fe   : > { %1250 = vmatpush.msrb.mxu0 %v1229_v57 }
 0x2ff   : > { %1139 = vmatpush.msra.mxu2 %v1113_v15 }
 0x300   : > { %1251 = vmatpush.msrb.mxu0 %v1228_v58 }
 0x351   : > { %v977_v59 = vpop.xlane.xlu1 %976 }
 0x352   : > { %1755 = vrcp.f32 %v977_v59  ;;  %v1227_v59 = vld [vmem:[%s2396_s16 + $0x18] sm:$0xff] }
 0x353   : > { %1252 = vmatpush.msrb.mxu0 %v1227_v59 }
 0x358   : > { %v1756_v60 = vpop.eup %1755 }
 0x35a   : > { %v1056_v61 = vpop.f32.mrf.mxu1 }
 0x35b   : > { %v1091_v62 = vmul.f32 %v1756_v60, %v1056_v61  ;;  %v980_v0 = vpop.xlane.xlu0 %979  ;;  %v1226_v60 = vld [vmem:[%s2396_s16 + $0x10] sm:$0xff]  ;;  %v1225_v61 = vld [vmem:[%s2396_s16 + $0x8] sm:$0xff] }
 0x35c   : > { %1253 = vmatpush.msrb.mxu0 %v1226_v60 }
 0x35d   : > { %1101 = vrot.lane.b32.xlu2 %v1091_v62, %s2062_s4  ;;  %v1224_v62 = vld [vmem:[%s2396_s16] sm:$0xff] }
 0x35e   : > { %1254 = vmatpush.msrb.mxu0 %v1225_v61 }
 0x360   : > { %1255 = vmatpush.msrb.mxu0 %v1224_v62 }
 0x361   : > { %v974_v63 = vpop.xlane.xlu2 %973 }
 0x362   : > { %1757 = vrcp.f32 %v974_v63  ;;  %v1743_v63 = vld [vmem:[%s769_s13] ss:$0 sm:$0xff] }
 0x363   : > { %1759 = vrcp.f32 %v980_v0 }
 0x368   : > { %v1758_v1 = vpop.eup %1757 }
 0x369   : > { %v971_v4 = vpop.xlane.xlu2 %970  ;;  %v1760_v6 = vpop.eup %1759 }
 0x36a   : > { %1761 = vrcp.f32 %v971_v4 }
 0x36b   : > { %1763 = vrcp.f32 %v2065_v25 }
 0x370   : > { %v1030_v2 = vpop.f32.mrf.mxu3  ;;  %v1762_v9 = vpop.eup %1761 }
 0x371   : > { %v1090_v3 = vmul.f32 %v1758_v1, %v1030_v2  ;;  %v1764_v26 = vpop.eup %1763 }
 0x372   : > { %v1151_v27 = vmul.f32 32.0, %v1764_v26  ;;  %vm1155_vm6 = vweird.f32 %v1764_v26 }
 0x373   : > { %1095 = vrot.lane.b32.xlu1 %v1090_v3, %s2063_s3 }
 0x374   : > { %v1152_v28 = vsub.f32 1.0, %v1151_v27 }
 0x376   : > { %v1153_v29 = vmul.f32 %v1764_v26, %v1152_v28 }
 0x378   : > { %v1082_v7 = vpop.f32.mrf.mxu1  ;;  %v1154_v30 = vadd.f32 %v1764_v26, %v1153_v29 }
 0x379   : > { %v1092_v8 = vmul.f32 %v1760_v6, %v1082_v7 }
 0x37a   : > { %v2449_v31 = vsel %vm1155_vm6, %v1764_v26, %v1154_v30 }
 0x37b   : > { %v1004_v10 = vpop.f32.mrf.mxu2  ;;  %1107 = vrot.lane.b32.xlu0 %v1092_v8, %s2064_s27 }
 0x37c   : > { %v1089_v11 = vmul.f32 %v1762_v9, %v1004_v10 }
 0x37e   : > { %1093 = vst.msk [vmem:[#allocation3] sm:$0xff] %vm830_vm2, %v1089_v11 }
 0x3b7   : > { %v1102_v17 = vpop.permute.xlu2 %1101 }
 0x3e5   : > { %v1096_v16 = vpop.permute.xlu1 %1095 }
 0x3e6   : > { %1099 = vst.msk [vmem:[#allocation3] sm:$0xff] %vm1098_vm3, %v1096_v16 }
 0x3e7   : > { %1105 = vst.msk [vmem:[#allocation3] sm:$0xff] %vm1104_vm4, %v1102_v17 }
 0x3ed   : > { %v1108_v18 = vpop.permute.xlu0 %1107 }
 0x3ee   : > { %1111 = vst.msk [vmem:[#allocation3] sm:$0xff] %vm1110_vm5, %v1108_v18 }
 0x3f5   : > { %v1112_v19 = vld [vmem:[#allocation3] sm:$0xff] }
 0x3f6   : > { %1590 = vmatmul.msk.f32.vlgmr.msra.gmra.mxu2 %vm797_vm1, %v1112_v19 }
 0x479   : > { %v1141_v21 = vpop.f32.mrf.mxu2 }
 0x47a   : > { %v1142_v22 = vadd.f32 %v1740_v20, %v1141_v21 }
 0x47c   : > { %v1144_v23 = vadd.f32 %v1142_v22, %v2413_v5 }
 0x47e   : > { %v1147_v24 = vsel %vm797_vm1, %v1144_v23, 0.0 }
 0x47f   : > { %1148 = vadd.xlane.f32.xlu1 %v1147_v24 }
 0x4f2   : > { %v1149_v32 = vpop.xlane.xlu1 %1148 }
 0x4f3   : > { %v1157_v5 = vmul.f32 %v2449_v31, %v1149_v32  ;;  %v1745_v32 = vld [vmem:[%s780_s9] ss:$0 sm:$0xff] }
 0x4f5   : > { %v1158_v33 = vsub.f32 %v1144_v23, %v1157_v5 }
 0x4f7   : > { %v1159_v34 = vmul.f32 %v1158_v33, %v1158_v33 }
 0x4f9   : > { %v1160_v35 = vsel %vm797_vm1, %v1159_v34, 0.0 }
 0x4fa   : > { %1161 = vadd.xlane.f32.xlu2 %v1160_v35 }
 0x56d   : > { %v1162_v40 = vpop.xlane.xlu2 %1161 }
 0x56e   : > { %v1163_v41 = vmul.f32 %v1162_v40, %v2449_v31 }
 0x570   : > { %v1164_v42 = vadd.f32 1e-05, %v1163_v41 }
 0x572   : > { %1765 = vrsqrt.f32 %v1164_v42  ;;  %vm1171_vm8 = vweird.f32 %v1164_v42 }
 0x578   : > { %v1766_v43 = vpop.eup %1765 }
 0x579   : > { %v1166_v44 = vmul.f32 %v1766_v43, %v1164_v42  ;;  %vm1172_vm7 = vweird.f32 %v1766_v43 }
 0x57a   : > { %vm1173_vm9 = vmor %vm1171_vm8, %vm1172_vm7 }
 0x57b   : > { %v1167_v45 = vmul.f32 %v1766_v43, %v1166_v44 }
 0x57d   : > { %v1168_v46 = vmul.f32 0.5, %v1167_v45 }
 0x57f   : > { %v1169_v47 = vsub.f32 1.5, %v1168_v46 }
 0x581   : > { %v1170_v48 = vmul.f32 %v1766_v43, %v1169_v47 }
 0x583   : > { %v1174_v50 = vsel %vm1173_vm9, %v1766_v43, %v1170_v48 }
 0x584   : > { %v1175_v51 = vmul.f32 %v1174_v50, %v1158_v33  ;;  %v1746_v33 = vld [vmem:[%s649_s0] ss:$0 sm:$0xff] }
 0x586   : > { %v1179_v53 = vmul.f32 %v1741_v49, %v1175_v51 }
 0x588   : > { %v1183_v54 = vadd.f32 %v1742_v52, %v1179_v53 }
 0x58a   : > { %1591 = vmatmul.msk.f32.vlgmr.msra.gmra.mxu3 %vm797_vm1, %v1183_v54 }
 0x60d   : > { %v1212_v0 = vpop.f32.mrf.mxu3 }
 0x60e   : > { %v1213_v1 = vadd.f32 %v1743_v63, %v1212_v0 }
 0x610   : > { %v1216_v2 = vmul.f32 0.044715, %v1213_v1  ;;  %v1215_v9 = vmul.f32 0.5, %v1213_v1 }
 0x612   : > { %v1217_v3 = vmul.f32 %v1216_v2, %v1213_v1 }
 0x614   : > { %v1218_v4 = vmul.f32 %v1217_v3, %v1213_v1 }
 0x616   : > { %v1219_v6 = vadd.f32 %v1218_v4, %v1213_v1 }
 0x618   : > { %v1220_v7 = vmul.f32 0.7978846, %v1219_v6 }
 0x61a   : > { %1767 = vtanh.f32 %v1220_v7 }
 0x620   : > { %v1768_v8 = vpop.eup %1767 }
 0x621   : > { %v1222_v10 = vadd.f32 1.0, %v1768_v8 }
 0x623   : > { %v1223_v11 = vmul.f32 %v1222_v10, %v1215_v9 }
 0x625   : > { %1592 = vmatmul.msk.f32.vlgmr.msrb.gmra.mxu0 %vm1236_vm10, %v1223_v11 }
 0x6a2   : > { %v1257_v13 = vpop.f32.mrf.mxu0 }
 0x6a3   : > { %v1258_v14 = vadd.f32 %v1744_v12, %v1257_v13 }
 0x6a5   : > { %v1260_v15 = vadd.f32 %v1258_v14, %v1183_v54 }
 0x6a7   : > { %v1263_v16 = vsel %vm797_vm1, %v1260_v15, 0.0 }
 0x6a8   : > { %1264 = vadd.xlane.f32.xlu0 %v1263_v16 }
 0x71b   : > { %v1265_v17 = vpop.xlane.xlu0 %1264 }
 0x71c   : > { %v1266_v18 = vmul.f32 %v1265_v17, %v2449_v31 }
 0x71e   : > { %v1267_v19 = vsub.f32 %v1260_v15, %v1266_v18 }
 0x720   : > { %v1268_v20 = vmul.f32 %v1267_v19, %v1267_v19 }
 0x722   : > { %v1269_v21 = vsel %vm797_vm1, %v1268_v20, 0.0 }
 0x723   : > { %1270 = vadd.xlane.f32.xlu1 %v1269_v21 }
 0x796   : > { %v1271_v22 = vpop.xlane.xlu1 %1270 }
 0x797   : > { %v1272_v23 = vmul.f32 %v1271_v22, %v2449_v31 }
 0x799   : > { %v1273_v24 = vadd.f32 1e-05, %v1272_v23 }
 0x79b   : > { %1769 = vrsqrt.f32 %v1273_v24  ;;  %vm1280_vm12 = vweird.f32 %v1273_v24 }
 0x7a1   : > { %v1770_v25 = vpop.eup %1769 }
 0x7a2   : > { %v1275_v26 = vmul.f32 %v1770_v25, %v1273_v24  ;;  %vm1281_vm11 = vweird.f32 %v1770_v25 }
 0x7a3   : > { %vm1282_vm13 = vmor %vm1280_vm12, %vm1281_vm11 }
 0x7a4   : > { %v1276_v27 = vmul.f32 %v1770_v25, %v1275_v26 }
 0x7a6   : > { %v1277_v28 = vmul.f32 0.5, %v1276_v27 }
 0x7a8   : > { %v1278_v29 = vsub.f32 1.5, %v1277_v28 }
 0x7aa   : > { %v1279_v30 = vmul.f32 %v1770_v25, %v1278_v29 }
 0x7ac   : > { %v1283_v5 = vsel %vm1282_vm13, %v1770_v25, %v1279_v30 }
 0x7ad   : > { %v1284_v31 = vmul.f32 %v1283_v5, %v1267_v19 }
 0x7af   : > { %v1288_v34 = vmul.f32 %v1745_v32, %v1284_v31  ;;  %1297 = sbr.rel (%p1593_p8) target bundleno = 1973 (0x7b5), region = 104 }
 0x7b1   : > { %v1292_v35 = vadd.f32 %v1746_v33, %v1288_v34 }
 0x7b3   : > { %1293 = vst.msk [vmem:[#allocation2] sm:$0xff] %vm797_vm1, %v1292_v35 }
 0x7b4   : > { %1298 = vst.msk [vmem:[%s2409_s19] sm:$0xff] %vm797_vm1, %v1292_v35 }
 0x7b5 PF: > { %s2653_s18 = sld [smem:[#allocation24_spill]]  ;;  %s1312_s26 = sshll.u32 %s2409_s19, 4  ;;  %s1313_s26 = int_to_ptr.vmem [resolvable:$true] %s1312_s26 }
 0x7b6   : > { %s2654_s6 = sld [smem:[#allocation27_spill]]  ;;  %s1300_s3 = scalar_lea.sflag [#allocation6], %s2331_s2 }
 0x7b7   : > { %s2655_s0 = sld [smem:[#allocation48_spill]] }
 0x7bb   : > { %s1595_s9 = sshll.u32 %s2653_s18, 3 }
 0x7bc   : > { %p2656_p10 = scmp.ne.s32.totalorder %s2654_s6, 0 }
 0x7bd   : > { %s1310_s28 = scalar_lea.hbm %s2655_s0, %s1595_s9  ;;  %s1941_s7 = scalar_lea.hbm %s2655_s0, 16 }
 0x7be   : > { %s1314_s4 = sshll.u32 %s1310_s28, 4  ;;  %s1315_s4 = int_to_ptr.hbm [resolvable:$true] %s1314_s4 }
 0x7bf   : > { %s1935_s27 = sshra.s32 %s1315_s4, 4  ;;  %s1936_s27 = int_to_ptr.hbm [resolvable:$true] %s1935_s27 }
 0x7c0   : > { %s1937_s14 = scalar_lea.hbm %s1936_s27, 8  ;;  %p1942_p2 = scmp.lt.s32.totalorder %s1936_s27, %s2655_s0 }
 0x7c1   : > { %p1938_p9 = scmp.ne.s32.totalorder %s1936_s27, %s1937_s14  ;;  %p1943_p4 = scmp.lt.s32.totalorder %s1941_s7, %s1937_s14 }
 0x7c3   : > { %p1939_p11 = pnand %p1938_p9, %p2656_p10  ;;  %p1944_p5 = por %p1943_p4, %p1942_p2 }
 0x7c5   : > { %p1940_p0 = pneg %p1939_p11 }
 0x7c7   : > { %p1945_p7 = pnand %p1944_p5, %p1940_p0 }
 0x7c9   : > { %1948 = shalt.err (!%p1945_p7)
}
 0x7ca   : > { %1612 = dma.vmem_to_hbm [thread:$0]  (%p2656_p10), %s1313_s26, 128, %s1315_s4, %s1300_s3  }
 0x7cb PF: > { %s2657_s2 = sld [smem:[#allocation20_spill]]  ;;  %p1635_p12 = scmp.ge.s32.totalorder %s2055_s23, 2 }
 0x7cc   : > { %s2658_s19 = sld [smem:[#allocation28_spill]] }
 0x7d1   : > { %s1326_s15 = sand.u32 1, %s2657_s2  }
 0x7d2   : > { %p2659_p13 = scmp.ne.s32.totalorder %s2658_s19, 0  ;;  %s1327_s1 = scalar_lea.sflag [#allocation6], %s1326_s15 }
 0x7d4   : > { %p1631_p1 = pnand %p1635_p12, %p2659_p13 }
 0x7d6   : > { %p1632_p3 = pneg %p1631_p1 }
 0x7d8   : > { %2010 = dma.done.wait (%p1632_p3), %s1327_s1, 128  }
 0x7d9   : > { %2012 = vsyncadd (%p1632_p3), %s1327_s1, 4294967168  ;;  %s36_s23 = sadd.s32 1, %s2055_s23   ;;  %s2660_s16 = sld [smem:[#allocation19_spill]] }
 0x7da   : > { %p33_p6 = scmp.ge.s32.totalorder %s36_s23, 6   ;;  %s2661_s15 = sld [smem:[#allocation32_spill]] }
 0x7db   : > { %s2662_s24 = sld [smem:[#allocation21_spill]]  ;;  %s2669_s29 = smov %s2019_s30 }
 0x7dc   : > { %s2663_s17 = sld [smem:[#allocation22_spill]] }
 0x7dd   : > { %s2664_s18 = sld [smem:[#allocation33_spill]]  ;;  %35 = sbr.rel (!%p33_p6) target bundleno = 29 (0x1d), region = 204 }
 0x7de   : > { %s2665_s19 = sld [smem:[#allocation25_spill]] }
 0x7df   : > { %s2666_s20 = sld [smem:[#allocation26_spill]]  ;;  %s2670_s30 = smov %s2660_s16 }
 0x7e0   : > { %s2667_s21 = sld [smem:[#allocation29_spill]] }
 0x7e1   : > { %s2668_s22 = sld [smem:[#allocation31_spill]]  ;;  %s2671_s16 = smov %s2662_s24 }
 0x7e2   :  { %1333 = vsyncpa [#allocation5], 1 }
 0x7e3   :  { %1335 = vsyncpa [#allocation5 + $0x1], 1 }
 0x7e4   :  { %1336 = vsyncpa [#allocation8], 1 }
 0x7e5   :  { %1338 = vsyncpa [#allocation8 + $0x1], 1 }
 0x7e6   :  { %1339 = vsyncpa [#allocation11], 1 }
 0x7e7   :  { %1341 = vsyncpa [#allocation11 + $0x1], 1 }
 0x7e8   :  { %1342 = vsyncpa [#allocation6], 1 }
 0x7e9   :  { %1344 = vsyncpa [#allocation6 + $0x1], 1 }

</bundles_post_ra>
